<compile_context>
chip_gen: v7x
topology: tpu7x:2x2x1
jax: 0.10.0
libtpu: 0.0.40
codegen_flags: <defaults>
</compile_context>

<pallas_src>
import jax
import jax.numpy as jnp
from jax.experimental import pallas as pl
from jax.experimental.pallas import tpu as pltpu


def _round_up(x: int, m: int) -> int:
    return ((x + m - 1) // m) * m


def _sublane(dtype) -> int:
    # f32 -> 8 rows per vreg, bf16 -> 16, int8/fp8 -> 32.
    return max(8, 32 // jnp.dtype(dtype).itemsize)


def _default_vmem_limit() -> int:
    try:
        cap = int(pltpu.get_tpu_info().vmem_capacity_bytes)
    except Exception:
        cap = 128 << 20
    if cap <= (64 << 20):
        # v7x-class core (64 MiB physical): leave headroom for compiler scratch.
        return min(cap - (12 << 20), 52 << 20)
    # v5e / v6e: 128 MiB physical, but small scoped default -> explicit override.
    return min(cap - (16 << 20), 112 << 20)


def _choose_tm(B: int, sublane: int, tm_max: int = 512) -> int:
    """Largest batch tile with <=12.5% pad waste and >=2 grid steps (megacore)."""
    tm_max = max(sublane, _round_up(tm_max, sublane))
    if B <= sublane:
        return sublane
    cands, t = [], tm_max
    while t > sublane:
        cands.append(t)
        t //= 2
    cands.append(sublane)
    for t in cands:
        bp = _round_up(B, t)
        waste = (bp - B) / bp
        if waste <= 0.125 and (bp // t >= 2 or t == sublane):
            return t
    return sublane


def _choose_tn(Wp: int, TM: int, itemsize: int, budget: int) -> int:
    """Largest linear2 output-feature tile whose VMEM footprint fits the budget."""
    nblk = Wp // 128
    for k in range(1, nblk + 1):
        if nblk % k:
            continue
        tn = Wp // k
        nbuf2 = 1 if k == 1 else 2          # w2/b2 are grid-invariant only when un-tiled
        need = (Wp * Wp                     # w1 (resident, single-buffered)
                + nbuf2 * Wp * tn           # w2 tile(s)
                + 2 * TM * Wp               # x (double-buffered)
                + 2 * TM * tn               # out (double-buffered)
                + TM * Wp                   # h scratch
                + 4 * Wp) * itemsize        # biases
        if need <= budget:
            return tn
    return 128


def basic_block_kernel(x_ref, w1_ref, b1_ref, w2_ref, b2_ref, o_ref, h_ref):
    # x_ref : (TM, Wp)            w1_ref: (Wp, Wp)  -- pre-transposed (in, out)
    # b1_ref: (1, Wp) f32         w2_ref: (Wp, TN)  -- pre-transposed (in, out) column tile
    # b2_ref: (1, TN) f32         o_ref : (TM, TN)  h_ref: (TM, Wp) VMEM scratch
    @pl.when(pl.program_id(1) == 0)
    def _():
        # activate1 + linear1 + activate2, computed once per batch tile.
        h = jnp.maximum(x_ref[...], 0)
        h = jnp.dot(h, w1_ref[...], preferred_element_type=jnp.float32)
        h = h + b1_ref[...]
        h_ref[...] = jnp.maximum(h, 0.0).astype(h_ref.dtype)

    # linear2 on the current output-feature tile.
    out = jnp.dot(h_ref[...], w2_ref[...], preferred_element_type=jnp.float32)
    out = out + b2_ref[...]
    o_ref[...] = out.astype(o_ref.dtype)


def basic_block(x, w1, b1, w2, b2, *, tm=None, tn=None,
                vmem_limit_bytes=None, use_bf16_mxu=False):
    """x: (B, W); w1, w2: (W, W) in PyTorch (out, in) layout; b1, b2: (W,)."""
    B, W = x.shape
    out_dtype = x.dtype

    # Optional precision/throughput tradeoff: bf16 MXU operands, f32 accumulation.
    if use_bf16_mxu and x.dtype == jnp.float32:
        x = x.astype(jnp.bfloat16)
        w1 = w1.astype(jnp.bfloat16)
        w2 = w2.astype(jnp.bfloat16)

    itemsize = jnp.dtype(x.dtype).itemsize
    sublane = _sublane(x.dtype)
    Wp = _round_up(W, 128)

    if vmem_limit_bytes is None:
        vmem_limit_bytes = _default_vmem_limit()
    vmem_limit_bytes = int(vmem_limit_bytes)

    TM = _choose_tm(B, sublane) if tm is None else max(sublane, _round_up(tm, sublane))
    Bp = _round_up(B, TM)
    if tn is None:
        TN = _choose_tn(Wp, TM, itemsize, int(vmem_limit_bytes * 0.9))
    else:
        TN = max(128, _round_up(tn, 128))
    if Wp % TN:
        TN = 128

    # Zero-pad to lane/sublane-dense shapes (padded rows/cols sliced off at the end).
    if (Bp, Wp) != (B, W):
        x = jnp.pad(x, ((0, Bp - B), (0, Wp - W)))
    if Wp != W:
        w1 = jnp.pad(w1, ((0, Wp - W), (0, Wp - W)))
        w2 = jnp.pad(w2, ((0, Wp - W), (0, Wp - W)))
        b1 = jnp.pad(b1, (0, Wp - W))
        b2 = jnp.pad(b2, (0, Wp - W))
    # One-time transpose to (in, out) layout: kernel contracts x @ w -> no XLU
    # transpose inside the body.
    w1t = w1.T
    w2t = w2.T
    b1 = b1.reshape(1, Wp).astype(jnp.float32)
    b2 = b2.reshape(1, Wp).astype(jnp.float32)

    grid = (Bp // TM, Wp // TN)
    n_steps = grid[1]
    w_isz = jnp.dtype(w1t.dtype).itemsize
    cost = pl.CostEstimate(
        flops=4 * Bp * Wp * Wp,                       # two (Bp,Wp)x(Wp,Wp) matmuls
        transcendentals=0,
        bytes_accessed=2 * Bp * Wp * itemsize + 2 * Wp * Wp * w_isz + 2 * Wp * 4,
    )

    def call(single_buffer_invariants):
        if single_buffer_invariants:
            inv_kw = dict(pipeline_mode=pl.Buffered(1))           # grid-invariant
            w2_kw = inv_kw if n_steps == 1 else {}                # invariant only if un-tiled
        else:
            inv_kw, w2_kw = {}, {}
        in_specs = [
            pl.BlockSpec((TM, Wp), lambda i, j: (i, 0)),          # x: tiled over batch
            pl.BlockSpec((Wp, Wp), lambda i, j: (0, 0), **inv_kw),   # w1: resident
            pl.BlockSpec((1, Wp), lambda i, j: (0, 0), **inv_kw),    # b1: resident
            pl.BlockSpec((Wp, TN), lambda i, j: (0, j), **w2_kw),    # w2: N-tiled
            pl.BlockSpec((1, TN), lambda i, j: (0, j), **w2_kw),     # b2: N-tiled
        ]
        return pl.pallas_call(
            basic_block_kernel,
            out_shape=jax.ShapeDtypeStruct((Bp, Wp), out_dtype),
            grid=grid,
            in_specs=in_specs,
            out_specs=pl.BlockSpec((TM, TN), lambda i, j: (i, j)),
            scratch_shapes=[pltpu.VMEM((TM, Wp), x.dtype)],
            compiler_params=pltpu.CompilerParams(
                dimension_semantics=("parallel", "arbitrary"),
                vmem_limit_bytes=vmem_limit_bytes,
            ),
            cost_estimate=cost,
        )(x, w1t, b1, w2t, b2)

    try:
        out = call(True)
    except Exception:
        # pl.Buffered(1) not supported by this jax version -> default double buffering.
        out = call(False)

    if (Bp, Wp) != (B, W):
        out = out[:B, :W]
    return out


def init_params(key, width, dtype=jnp.float32):
    """Deterministic init mimicking torch.nn.Linear default (uniform +-1/sqrt(in))."""
    k1, k2, k3, k4 = jax.random.split(key, 4)
    bound = 1.0 / jnp.sqrt(width)
    w1 = jax.random.uniform(k1, (width, width), dtype, -bound, bound)  # (out, in)
    b1 = jax.random.uniform(k2, (width,), dtype, -bound, bound)
    w2 = jax.random.uniform(k3, (width, width), dtype, -bound, bound)
    b2 = jax.random.uniform(k4, (width,), dtype, -bound, bound)
    return w1, b1, w2, b2


def basic_block_ref(x, w1, b1, w2, b2):
    h = jnp.maximum(x, 0.0)
    h = h @ w1.T + b1
    h = jnp.maximum(h, 0.0)
    return h @ w2.T + b2


if __name__ == "__main__":
    key = jax.random.PRNGKey(0)
    kx, kp, kx2, kp2, kx3, kp3 = jax.random.split(key, 6)

    # Small shapes consistent with the module (padded internally to (8, 128)).
    batch, width = 2, 32
    x = jax.random.normal(kx, (batch, width), jnp.float32)
    params = init_params(kp, width)
    out = jax.block_until_ready(basic_block(x, *params))
    ref = basic_block_ref(x, *params)
    assert out.shape == (batch, width)
    assert jnp.allclose(out, ref, atol=1e-4, rtol=1e-4)

    # Multi-step batch grid, no feature padding.
    batch2, width2 = 24, 128
    x2 = jax.random.normal(kx2, (batch2, width2), jnp.float32)
    p2 = init_params(kp2, width2)
    out2 = jax.block_until_ready(basic_block(x2, *p2))
    ref2 = basic_block_ref(x2, *p2)
    assert out2.shape == (batch2, width2)
    assert jnp.allclose(out2, ref2, atol=1e-4, rtol=1e-4)

    # Exercise the N-tiled linear2 path (2x2 grid, h-scratch reuse across column tiles).
    batch3, width3 = 16, 256
    x3 = jax.random.normal(kx3, (batch3, width3), jnp.float32)
    p3 = init_params(kp3, width3)
    out3 = jax.block_until_ready(basic_block(x3, *p3, tn=128))
    ref3 = basic_block_ref(x3, *p3)
    assert out3.shape == (batch3, width3)
    assert jnp.allclose(out3, ref3, atol=1e-4, rtol=1e-4)

    print("KERNEL_OK")
</pallas_src>

<mosaic_0001>
module attributes {stable_mosaic.version = 11 : i64} {
  func.func @basic_block_kernel(%arg0: i32, %arg1: i32, %arg2: memref<8x128xf32, #tpu.memory_space<vmem>>, %arg3: memref<128x128xf32, #tpu.memory_space<vmem>>, %arg4: memref<1x128xf32, #tpu.memory_space<vmem>>, %arg5: memref<128x128xf32, #tpu.memory_space<vmem>>, %arg6: memref<1x128xf32, #tpu.memory_space<vmem>>, %arg7: memref<8x128xf32, #tpu.memory_space<vmem>>, %arg8: memref<8x128xf32, #tpu.memory_space<vmem>>) attributes {dimension_semantics = [#tpu.dimension_semantics<parallel>, #tpu.dimension_semantics<arbitrary>], iteration_bounds = array<i64: 1, 1>, scalar_prefetch = 0 : i64, scratch_operands = 1 : i64, tpu.core_type = #tpu.core_type<tc>, window_params = [{transform_indices = @transform_0, window_bounds = array<i64: 8, 128>}, {pipeline_mode = #tpu.pipeline_mode<synchronous>, transform_indices = @transform_1, window_bounds = array<i64: 128, 128>}, {pipeline_mode = #tpu.pipeline_mode<synchronous>, transform_indices = @transform_2, window_bounds = array<i64: 1, 128>}, {pipeline_mode = #tpu.pipeline_mode<synchronous>, transform_indices = @transform_3, window_bounds = array<i64: 128, 128>}, {pipeline_mode = #tpu.pipeline_mode<synchronous>, transform_indices = @transform_4, window_bounds = array<i64: 1, 128>}, {transform_indices = @transform_5, window_bounds = array<i64: 8, 128>}]} {
    %c0_i32 = arith.constant 0 : i32
    %0 = arith.cmpi eq, %arg1, %c0_i32 : i32
    %1 = arith.extui %0 : i1 to i32
    %c0_i32_0 = arith.constant 0 : i32
    %2 = arith.cmpi ne, %1, %c0_i32_0 : i32
    scf.if %2 {
      %c0_8 = arith.constant 0 : index
      %c0_9 = arith.constant 0 : index
      %10 = vector.load %arg2[%c0_8, %c0_9] : memref<8x128xf32, #tpu.memory_space<vmem>>, vector<8x128xf32>
      %cst_10 = arith.constant 0.000000e+00 : f32
      %11 = vector.broadcast %cst_10 : f32 to vector<8x128xf32>
      %12 = arith.maximumf %10, %11 : vector<8x128xf32>
      %c0_11 = arith.constant 0 : index
      %c0_12 = arith.constant 0 : index
      %13 = vector.load %arg3[%c0_11, %c0_12] : memref<128x128xf32, #tpu.memory_space<vmem>>, vector<128x128xf32>
      %cst_13 = arith.constant dense<0.000000e+00> : vector<8x128xf32>
      %14 = tpu.matmul %12, %13, %cst_13 {dimension_numbers = #tpu.dot_dimension_numbers<[1], [0], [0], [1], [0, 0, 1, 1], [], []>} : vector<8x128xf32>, vector<128x128xf32>, vector<8x128xf32> -> vector<8x128xf32>
      %c0_14 = arith.constant 0 : index
      %c0_15 = arith.constant 0 : index
      %15 = vector.load %arg4[%c0_14, %c0_15] : memref<1x128xf32, #tpu.memory_space<vmem>>, vector<1x128xf32>
      %16 = vector.broadcast %15 : vector<1x128xf32> to vector<8x128xf32>
      %17 = arith.addf %14, %16 : vector<8x128xf32>
      %cst_16 = arith.constant 0.000000e+00 : f32
      %18 = vector.broadcast %cst_16 : f32 to vector<8x128xf32>
      %19 = arith.maximumf %17, %18 : vector<8x128xf32>
      %c0_17 = arith.constant 0 : index
      %c0_18 = arith.constant 0 : index
      %20 = vector.load %arg8[%c0_17, %c0_18] : memref<8x128xf32, #tpu.memory_space<vmem>>, vector<8x128xf32>
      tpu.vector_store %arg8[%c0_17, %c0_18], %19 {strides = array<i32>} : memref<8x128xf32, #tpu.memory_space<vmem>>, vector<8x128xf32>,
    } else {
    }
    %c0 = arith.constant 0 : index
    %c0_1 = arith.constant 0 : index
    %3 = vector.load %arg8[%c0, %c0_1] : memref<8x128xf32, #tpu.memory_space<vmem>>, vector<8x128xf32>
    %c0_2 = arith.constant 0 : index
    %c0_3 = arith.constant 0 : index
    %4 = vector.load %arg5[%c0_2, %c0_3] : memref<128x128xf32, #tpu.memory_space<vmem>>, vector<128x128xf32>
    %cst = arith.constant dense<0.000000e+00> : vector<8x128xf32>
    %5 = tpu.matmul %3, %4, %cst {dimension_numbers = #tpu.dot_dimension_numbers<[1], [0], [0], [1], [0, 0, 1, 1], [], []>} : vector<8x128xf32>, vector<128x128xf32>, vector<8x128xf32> -> vector<8x128xf32>
    %c0_4 = arith.constant 0 : index
    %c0_5 = arith.constant 0 : index
    %6 = vector.load %arg6[%c0_4, %c0_5] : memref<1x128xf32, #tpu.memory_space<vmem>>, vector<1x128xf32>
    %7 = vector.broadcast %6 : vector<1x128xf32> to vector<8x128xf32>
    %8 = arith.addf %5, %7 : vector<8x128xf32>
    %c0_6 = arith.constant 0 : index
    %c0_7 = arith.constant 0 : index
    %9 = vector.load %arg7[%c0_6, %c0_7] : memref<8x128xf32, #tpu.memory_space<vmem>>, vector<8x128xf32>
    tpu.vector_store %arg7[%c0_6, %c0_7], %8 {strides = array<i32>} : memref<8x128xf32, #tpu.memory_space<vmem>>, vector<8x128xf32>,
    return
  }
  func.func @transform_0(%arg0: i32, %arg1: i32) -> (i32, i32) {
    %c0_i32 = arith.constant 0 : i32
    %c0_i32_0 = arith.constant 0 : i32
    return %arg0, %c0_i32 : i32, i32
  }
  func.func @transform_1(%arg0: i32, %arg1: i32) -> (i32, i32) {
    %c0_i32 = arith.constant 0 : i32
    %c0_i32_0 = arith.constant 0 : i32
    %c0_i32_1 = arith.constant 0 : i32
    return %c0_i32, %c0_i32_0 : i32, i32
  }
  func.func @transform_2(%arg0: i32, %arg1: i32) -> (i32, i32) {
    %c0_i32 = arith.constant 0 : i32
    %c0_i32_0 = arith.constant 0 : i32
    %c0_i32_1 = arith.constant 0 : i32
    return %c0_i32, %c0_i32_0 : i32, i32
  }
  func.func @transform_3(%arg0: i32, %arg1: i32) -> (i32, i32) {
    %c0_i32 = arith.constant 0 : i32
    %c0_i32_0 = arith.constant 0 : i32
    return %c0_i32, %arg1 : i32, i32
  }
  func.func @transform_4(%arg0: i32, %arg1: i32) -> (i32, i32) {
    %c0_i32 = arith.constant 0 : i32
    %c0_i32_0 = arith.constant 0 : i32
    return %c0_i32, %arg1 : i32, i32
  }
  func.func @transform_5(%arg0: i32, %arg1: i32) -> (i32, i32) {
    %c0_i32 = arith.constant 0 : i32
    return %arg0, %arg1 : i32, i32
  }
}

module attributes {stable_mosaic.version = 11 : i64} {
  func.func @basic_block_kernel(%arg0: i32, %arg1: i32, %arg2: memref<8x128xf32, #tpu.memory_space<vmem>>, %arg3: memref<128x128xf32, #tpu.memory_space<vmem>>, %arg4: memref<1x128xf32, #tpu.memory_space<vmem>>, %arg5: memref<128x128xf32, #tpu.memory_space<vmem>>, %arg6: memref<1x128xf32, #tpu.memory_space<vmem>>, %arg7: memref<8x128xf32, #tpu.memory_space<vmem>>, %arg8: memref<8x128xf32, #tpu.memory_space<vmem>>) attributes {dimension_semantics = [#tpu.dimension_semantics<parallel>, #tpu.dimension_semantics<arbitrary>], iteration_bounds = array<i64: 1, 1>, scalar_prefetch = 0 : i64, scratch_operands = 1 : i64, tpu.core_type = #tpu.core_type<tc>, window_params = [{transform_indices = @transform_0, window_bounds = array<i64: 8, 128>}, {pipeline_mode = #tpu.pipeline_mode<synchronous>, transform_indices = @transform_1, window_bounds = array<i64: 128, 128>}, {pipeline_mode = #tpu.pipeline_mode<synchronous>, transform_indices = @transform_2, window_bounds = array<i64: 1, 128>}, {transform_indices = @transform_3, window_bounds = array<i64: 128, 128>}, {transform_indices = @transform_4, window_bounds = array<i64: 1, 128>}, {transform_indices = @transform_5, window_bounds = array<i64: 8, 128>}]} {
    %c0_i32 = arith.constant 0 : i32
    %0 = arith.cmpi eq, %arg1, %c0_i32 : i32
    %1 = arith.extui %0 : i1 to i32
    %c0_i32_0 = arith.constant 0 : i32
    %2 = arith.cmpi ne, %1, %c0_i32_0 : i32
    scf.if %2 {
      %c0_8 = arith.constant 0 : index
      %c0_9 = arith.constant 0 : index
      %10 = vector.load %arg2[%c0_8, %c0_9] : memref<8x128xf32, #tpu.memory_space<vmem>>, vector<8x128xf32>
      %cst_10 = arith.constant 0.000000e+00 : f32
      %11 = vector.broadcast %cst_10 : f32 to vector<8x128xf32>
      %12 = arith.maximumf %10, %11 : vector<8x128xf32>
      %c0_11 = arith.constant 0 : index
      %c0_12 = arith.constant 0 : index
      %13 = vector.load %arg3[%c0_11, %c0_12] : memref<128x128xf32, #tpu.memory_space<vmem>>, vector<128x128xf32>
      %cst_13 = arith.constant dense<0.000000e+00> : vector<8x128xf32>
      %14 = tpu.matmul %12, %13, %cst_13 {dimension_numbers = #tpu.dot_dimension_numbers<[1], [0], [0], [1], [0, 0, 1, 1], [], []>} : vector<8x128xf32>, vector<128x128xf32>, vector<8x128xf32> -> vector<8x128xf32>
      %c0_14 = arith.constant 0 : index
      %c0_15 = arith.constant 0 : index
      %15 = vector.load %arg4[%c0_14, %c0_15] : memref<1x128xf32, #tpu.memory_space<vmem>>, vector<1x128xf32>
      %16 = vector.broadcast %15 : vector<1x128xf32> to vector<8x128xf32>
      %17 = arith.addf %14, %16 : vector<8x128xf32>
      %cst_16 = arith.constant 0.000000e+00 : f32
      %18 = vector.broadcast %cst_16 : f32 to vector<8x128xf32>
      %19 = arith.maximumf %17, %18 : vector<8x128xf32>
      %c0_17 = arith.constant 0 : index
      %c0_18 = arith.constant 0 : index
      %20 = vector.load %arg8[%c0_17, %c0_18] : memref<8x128xf32, #tpu.memory_space<vmem>>, vector<8x128xf32>
      tpu.vector_store %arg8[%c0_17, %c0_18], %19 {strides = array<i32>} : memref<8x128xf32, #tpu.memory_space<vmem>>, vector<8x128xf32>,
    } else {
    }
    %c0 = arith.constant 0 : index
    %c0_1 = arith.constant 0 : index
    %3 = vector.load %arg8[%c0, %c0_1] : memref<8x128xf32, #tpu.memory_space<vmem>>, vector<8x128xf32>
    %c0_2 = arith.constant 0 : index
    %c0_3 = arith.constant 0 : index
    %4 = vector.load %arg5[%c0_2, %c0_3] : memref<128x128xf32, #tpu.memory_space<vmem>>, vector<128x128xf32>
    %cst = arith.constant dense<0.000000e+00> : vector<8x128xf32>
    %5 = tpu.matmul %3, %4, %cst {dimension_numbers = #tpu.dot_dimension_numbers<[1], [0], [0], [1], [0, 0, 1, 1], [], []>} : vector<8x128xf32>, vector<128x128xf32>, vector<8x128xf32> -> vector<8x128xf32>
    %c0_4 = arith.constant 0 : index
    %c0_5 = arith.constant 0 : index
    %6 = vector.load %arg6[%c0_4, %c0_5] : memref<1x128xf32, #tpu.memory_space<vmem>>, vector<1x128xf32>
    %7 = vector.broadcast %6 : vector<1x128xf32> to vector<8x128xf32>
    %8 = arith.addf %5, %7 : vector<8x128xf32>
    %c0_6 = arith.constant 0 : index
    %c0_7 = arith.constant 0 : index
    %9 = vector.load %arg7[%c0_6, %c0_7] : memref<8x128xf32, #tpu.memory_space<vmem>>, vector<8x128xf32>
    tpu.vector_store %arg7[%c0_6, %c0_7], %8 {strides = array<i32>} : memref<8x128xf32, #tpu.memory_space<vmem>>, vector<8x128xf32>,
    return
  }
  func.func @transform_0(%arg0: i32, %arg1: i32) -> (i32, i32) {
    %c0_i32 = arith.constant 0 : i32
    %c0_i32_0 = arith.constant 0 : i32
    return %arg0, %c0_i32 : i32, i32
  }
  func.func @transform_1(%arg0: i32, %arg1: i32) -> (i32, i32) {
    %c0_i32 = arith.constant 0 : i32
    %c0_i32_0 = arith.constant 0 : i32
    %c0_i32_1 = arith.constant 0 : i32
    return %c0_i32, %c0_i32_0 : i32, i32
  }
  func.func @transform_2(%arg0: i32, %arg1: i32) -> (i32, i32) {
    %c0_i32 = arith.constant 0 : i32
    %c0_i32_0 = arith.constant 0 : i32
    %c0_i32_1 = arith.constant 0 : i32
    return %c0_i32, %c0_i32_0 : i32, i32
  }
  func.func @transform_3(%arg0: i32, %arg1: i32) -> (i32, i32) {
    %c0_i32 = arith.constant 0 : i32
    %c0_i32_0 = arith.constant 0 : i32
    return %c0_i32, %arg1 : i32, i32
  }
  func.func @transform_4(%arg0: i32, %arg1: i32) -> (i32, i32) {
    %c0_i32 = arith.constant 0 : i32
    %c0_i32_0 = arith.constant 0 : i32
    return %c0_i32, %arg1 : i32, i32
  }
  func.func @transform_5(%arg0: i32, %arg1: i32) -> (i32, i32) {
    %c0_i32 = arith.constant 0 : i32
    return %arg0, %arg1 : i32, i32
  }
}

</mosaic_0001>

<bundles_post_ra>
// kernel: tpu_custom_call.1
= control target key start
LH: loop header
LB: loop body
LE: loop exit
PB: predicated region body
PF: predicated region fallthrough
CT: control target
= control target key end

     0   :  { %10 = vsyncpa [#allocation4], 0  ;;  %s730_s0 = inlined_call_operand.hbm [shape: f32[8,128], index: 0, kind: input, shape index: {}]   ;;  %s731_s1 = inlined_call_operand.hbm [shape: f32[128,128], index: 1, kind: input, shape index: {}]   ;;  %s732_s2 = inlined_call_operand.hbm [shape: f32[1,128], index: 2, kind: input, shape index: {}]   ;;  %s733_s3 = inlined_call_operand.hbm [shape: f32[128,128], index: 3, kind: input, shape index: {}]   ;;  %s734_s4 = inlined_call_operand.hbm [shape: f32[1,128], index: 4, kind: input, shape index: {}]   ;;  %s735_s5 = inlined_call_operand.hbm [shape: f32[8,128], index: 5, kind: output, shape index: {}]  }
   0x1   :  { %11 = vsyncpa [#allocation7], 0 }
   0x2   :  { %12 = vsyncpa [#allocation10], 0 }
   0x3   :  { %13 = vsyncpa [#allocation5], 0  ;;  %s601_s18 = smov [#allocation6]   ;;  %s461_s22 = scalar_lea.hbm %s731_s1, 2048 }
   0x4   :  { %s29_s19 = sshll.u32 %s601_s18, 4  ;;  %p462_p0 = scmp.ne.s32.totalorder %s731_s1, %s461_s22  ;;  %s30_s19 = int_to_ptr.vmem [resolvable:$true] %s29_s19 }
   0x5   :  { %p465_p1 = scmp.lt.u32.totalorder %s461_s22, %s731_s1 }
   0x7   :  { %p467_p2 = pnand %p465_p1, %p462_p0 }
   0x9   :  { %470 = shalt.err (!%p467_p2)
}
   0xa   :  { %s471_s27 = scalar_lea.vmem %s30_s19, 2048  ;;  %p476_p4 = scmp.lt.s32.totalorder %s30_s19, %s30_s19 }
   0xb   :  { %p472_p3 = scmp.ne.s32.totalorder %s30_s19, %s471_s27  ;;  %p477_p5 = scmp.lt.s32.totalorder %s471_s27, %s471_s27 }
   0xd   :  { %p478_p6 = por %p477_p5, %p476_p4 }
   0xf   :  { %p479_p7 = pnand %p478_p6, %p472_p3 }
  0x11   :  { %482 = shalt.err (!%p479_p7)
}
  0x12   :  { %s602_s28 = smov 128   ;;  %s603_s29 = smov 8  }
  0x13   :  { %35 = dma.hbm_to_vmem [thread:$0]  %s731_s1, 2048, %s30_s19, [#allocation7], %s602_s28, %s602_s28, %s603_s29  }
  0x14   :  { %s604_s7 = smov [#allocation9]   ;;  %s605_s9 = smov [#allocation3]  }
  0x15   :  { %s51_s8 = sshll.u32 %s604_s7, 4  ;;  %s20_s10 = sshll.u32 %s605_s9, 4  ;;  %s52_s8 = int_to_ptr.vmem [resolvable:$true] %s51_s8  ;;  %s21_s10 = int_to_ptr.vmem [resolvable:$true] %s20_s10 }
  0x16   :  { %s483_s13 = scalar_lea.hbm %s733_s3, 2048 }
  0x17   :  { %p484_p8 = scmp.ne.s32.totalorder %s733_s3, %s483_s13  ;;  %p487_p9 = scmp.lt.u32.totalorder %s483_s13, %s733_s3 }
  0x19   :  { %p489_p10 = pnand %p487_p9, %p484_p8 }
  0x1b   :  { %492 = shalt.err (!%p489_p10)
}
  0x1c   :  { %s493_s1 = scalar_lea.vmem %s52_s8, 2048  ;;  %p498_p12 = scmp.lt.s32.totalorder %s52_s8, %s52_s8 }
  0x1d   :  { %p494_p11 = scmp.ne.s32.totalorder %s52_s8, %s493_s1  ;;  %p499_p13 = scmp.lt.s32.totalorder %s493_s1, %s493_s1 }
  0x1f   :  { %p500_p0 = por %p499_p13, %p498_p12 }
  0x21   :  { %p501_p1 = pnand %p500_p0, %p494_p11 }
  0x23   :  { %504 = shalt.err (!%p501_p1)
}
  0x24   :  { %57 = dma.hbm_to_vmem [thread:$0]  %s733_s3, 2048, %s52_s8, [#allocation10], %s602_s28, %s602_s28, %s603_s29  }
  0x25   :  { %s505_s22 = scalar_lea.hbm %s730_s0, 128 }
  0x26   :  { %p506_p2 = scmp.ne.s32.totalorder %s730_s0, %s505_s22  ;;  %p509_p3 = scmp.lt.u32.totalorder %s505_s22, %s730_s0 }
  0x28   :  { %p511_p4 = pnand %p509_p3, %p506_p2 }
  0x2a   :  { %514 = shalt.err (!%p511_p4)
}
  0x2b   :  { %s515_s27 = scalar_lea.vmem %s21_s10, 128  ;;  %p520_p6 = scmp.lt.s32.totalorder %s21_s10, %s21_s10 }
  0x2c   :  { %p516_p5 = scmp.ne.s32.totalorder %s21_s10, %s515_s27  ;;  %p521_p7 = scmp.lt.s32.totalorder %s515_s27, %s515_s27 }
  0x2e   :  { %p522_p8 = por %p521_p7, %p520_p6 }
  0x30   :  { %p523_p9 = pnand %p522_p8, %p516_p5 }
  0x32   :  { %526 = shalt.err (!%p523_p9)
}
  0x33   :  { %23 = dma.hbm_to_vmem [thread:$0]  %s730_s0, 128, %s21_s10, [#allocation4]  }
  0x34   :  { %s606_s29 = smov [#allocation8]   ;;  %s607_s6 = smov [#allocation11]  }
  0x35   :  { %s42_s30 = sshll.u32 %s606_s29, 4  ;;  %s64_s7 = sshll.u32 %s607_s6, 4  ;;  %s43_s30 = int_to_ptr.vmem [resolvable:$true] %s42_s30  ;;  %s65_s7 = int_to_ptr.vmem [resolvable:$true] %s64_s7 }
  0x36   :  { %s527_s11 = scalar_lea.hbm %s732_s2, 16 }
  0x37   :  { %p528_p10 = scmp.ne.s32.totalorder %s732_s2, %s527_s11  ;;  %p531_p11 = scmp.lt.u32.totalorder %s527_s11, %s732_s2 }
  0x39   :  { %p533_p12 = pnand %p531_p11, %p528_p10 }
  0x3b   :  { %536 = shalt.err (!%p533_p12)
}
  0x3c   :  { %s537_s0 = scalar_lea.vmem %s43_s30, 16  ;;  %s541_s10 = scalar_lea.vmem %s43_s30, 32 }
  0x3d   :  { %p538_p13 = scmp.ne.s32.totalorder %s43_s30, %s537_s0  ;;  %p542_p0 = scmp.lt.s32.totalorder %s43_s30, %s43_s30 }
  0x3e   :  { %p543_p1 = scmp.lt.s32.totalorder %s541_s10, %s537_s0 }
  0x40   :  { %p544_p2 = por %p543_p1, %p542_p0 }
  0x42   :  { %p545_p3 = pnand %p544_p2, %p538_p13 }
  0x44   :  { %548 = shalt.err (!%p545_p3)
}
  0x45   :  { %45 = dma.hbm_to_vmem [thread:$0]  %s732_s2, 16, %s43_s30, [#allocation7]  }
  0x46   :  { %s549_s19 = scalar_lea.hbm %s734_s4, 16 }
  0x47   :  { %p550_p4 = scmp.ne.s32.totalorder %s734_s4, %s549_s19  ;;  %p553_p5 = scmp.lt.u32.totalorder %s549_s19, %s734_s4 }
  0x49   :  { %p555_p6 = pnand %p553_p5, %p550_p4 }
  0x4b   :  { %558 = shalt.err (!%p555_p6)
}
  0x4c   :  { %s559_s24 = scalar_lea.vmem %s65_s7, 16  ;;  %s563_s25 = scalar_lea.vmem %s65_s7, 32 }
  0x4d   :  { %p560_p7 = scmp.ne.s32.totalorder %s65_s7, %s559_s24  ;;  %p564_p8 = scmp.lt.s32.totalorder %s65_s7, %s65_s7 }
  0x4e   :  { %p565_p9 = scmp.lt.s32.totalorder %s563_s25, %s559_s24 }
  0x50   :  { %p566_p10 = por %p565_p9, %p564_p8 }
  0x52   :  { %p567_p11 = pnand %p566_p10, %p560_p7 }
  0x54   :  { %570 = shalt.err (!%p567_p11)
}
  0x55   :  { %67 = dma.hbm_to_vmem [thread:$0]  %s734_s4, 16, %s65_s7, [#allocation10]  }
  0x56   :  { %593 = dma.done.wait [#allocation4], 128  }
  0x57   :  { %594 = vsyncadd [#allocation4], 4294967168 }
  0x58   :  { %595 = dma.done.wait [#allocation7], 2064  }
  0x59   :  { %596 = vsyncadd [#allocation7], 4294965232 }
  0x5a   :  { %597 = dma.done.wait [#allocation10], 2064  }
  0x5b   :  { %598 = vsyncadd [#allocation10], 4294965232  ;;  %v608_v0 = vmov 0.0|0.0   ;;  %vm609_vm0 = vmmov 0   ;;  %v610_v1 = vmov 0.0   ;;  %v89_v2 = vld [vmem:[#allocation6] sm:$0xff] }
  0x5c   :  { %402 = vmatprep.subr.bf16.mxu0 %v608_v0  ;;  %364 = vmatprep.mubr.msk.f32.mxu0 %vm609_vm0, %v610_v1  ;;  %v90_v3 = vld [vmem:[#allocation6 + $0x8] sm:$0xff]  ;;  %v91_v4 = vld [vmem:[#allocation6 + $0x10] sm:$0xff]  ;;  %v92_v6 = vld [vmem:[#allocation6 + $0x18] sm:$0xff]  ;;  %s611_s4 = smov [#allocation12]  }
  0x5d   :  { %426 = vmatprep.subr.bf16.mxu1 %v608_v0  ;;  %399 = vmatprep.mubr.msk.f32.mxu1 %vm609_vm0, %v610_v1  ;;  %v403_v5 = vpack.c.bf16 %v90_v3, %v89_v2  ;;  %v406_v7 = vpack.c.bf16 %v92_v6, %v91_v4  ;;  %v93_v8 = vld [vmem:[#allocation6 + $0x20] sm:$0xff]  ;;  %v94_v9 = vld [vmem:[#allocation6 + $0x28] sm:$0xff]  ;;  %v187_v12 = vld [vmem:[#allocation9 + $0x10] sm:$0xff]  ;;  %s285_s27 = sshll.u32 %s611_s4, 4  ;;  %s286_s27 = int_to_ptr.vmem [resolvable:$true] %s285_s27 }
  0x5e   :  { %v185_v10 = vld [vmem:[#allocation9] sm:$0xff]  ;;  %v186_v11 = vld [vmem:[#allocation9 + $0x8] sm:$0xff]  ;;  %v188_v13 = vld [vmem:[#allocation9 + $0x18] sm:$0xff]  ;;  %v409_v14 = vpack.c.bf16 %v94_v9, %v93_v8  ;;  %s571_s3 = scalar_lea.vmem %s286_s27, 128  ;;  %p576_p13 = scmp.lt.s32.totalorder %s286_s27, %s286_s27 }
  0x5f   :  { %404 = vmatpush3.bf16.msra.mxu0 %v403_v5  ;;  %v427_v15 = vpack.c.bf16 %v186_v11, %v185_v10  ;;  %v95_v16 = vld [vmem:[#allocation6 + $0x30] sm:$0xff]  ;;  %v96_v17 = vld [vmem:[#allocation6 + $0x38] sm:$0xff]  ;;  %v430_v18 = vpack.c.bf16 %v188_v13, %v187_v12  ;;  %v189_v19 = vld [vmem:[#allocation9 + $0x20] sm:$0xff]  ;;  %p572_p12 = scmp.ne.s32.totalorder %s286_s27, %s571_s3  ;;  %p577_p0 = scmp.lt.s32.totalorder %s571_s3, %s571_s3 }
  0x60   :  { %405 = vmatprep.subr.bf16.mxu0 %v608_v0  ;;  %v190_v20 = vld [vmem:[#allocation9 + $0x28] sm:$0xff]  ;;  %v412_v21 = vpack.c.bf16 %v96_v17, %v95_v16  ;;  %v97_v22 = vld [vmem:[#allocation6 + $0x40] sm:$0xff]  ;;  %v191_v25 = vld [vmem:[#allocation9 + $0x30] sm:$0xff] }
  0x61   :  { %428 = vmatpush3.bf16.msra.mxu1 %v427_v15  ;;  %v98_v23 = vld [vmem:[#allocation6 + $0x48] sm:$0xff]  ;;  %v433_v24 = vpack.c.bf16 %v190_v20, %v189_v19  ;;  %v192_v26 = vld [vmem:[#allocation9 + $0x38] sm:$0xff]  ;;  %v99_v28 = vld [vmem:[#allocation6 + $0x50] sm:$0xff]  ;;  %p578_p1 = por %p577_p0, %p576_p13 }
  0x62   :  { %429 = vmatprep.subr.bf16.mxu1 %v608_v0  ;;  %v415_v27 = vpack.c.bf16 %v98_v23, %v97_v22  ;;  %v100_v29 = vld [vmem:[#allocation6 + $0x58] sm:$0xff]  ;;  %v436_v30 = vpack.c.bf16 %v192_v26, %v191_v25  ;;  %v193_v31 = vld [vmem:[#allocation9 + $0x40] sm:$0xff]  ;;  %v194_v32 = vld [vmem:[#allocation9 + $0x48] sm:$0xff] }
  0x63   :  { %407 = vmatpush3.bf16.msra.mxu0 %v406_v7  ;;  %v418_v33 = vpack.c.bf16 %v100_v29, %v99_v28  ;;  %v101_v34 = vld [vmem:[#allocation6 + $0x60] sm:$0xff]  ;;  %v102_v35 = vld [vmem:[#allocation6 + $0x68] sm:$0xff]  ;;  %v439_v36 = vpack.c.bf16 %v194_v32, %v193_v31  ;;  %v195_v37 = vld [vmem:[#allocation9 + $0x50] sm:$0xff]  ;;  %p579_p2 = pnand %p578_p1, %p572_p12 }
  0x64   :  { %408 = vmatprep.subr.bf16.mxu0 %v608_v0  ;;  %v196_v38 = vld [vmem:[#allocation9 + $0x58] sm:$0xff]  ;;  %v421_v39 = vpack.c.bf16 %v102_v35, %v101_v34  ;;  %v103_v40 = vld [vmem:[#allocation6 + $0x70] sm:$0xff]  ;;  %v197_v43 = vld [vmem:[#allocation9 + $0x60] sm:$0xff] }
  0x65   :  { %431 = vmatpush3.bf16.msra.mxu1 %v430_v18  ;;  %v104_v41 = vld [vmem:[#allocation6 + $0x78] sm:$0xff]  ;;  %v442_v42 = vpack.c.bf16 %v196_v38, %v195_v37  ;;  %v198_v44 = vld [vmem:[#allocation9 + $0x68] sm:$0xff]  ;;  %v296_v52 = vld [vmem:[#allocation8] ss:$0 sm:$0xff] }
  0x66   :  { %432 = vmatprep.subr.bf16.mxu1 %v608_v0  ;;  %v424_v45 = vpack.c.bf16 %v104_v41, %v103_v40  ;;  %v87_v46 = vld [vmem:[#allocation3] sm:$0xff]  ;;  %v445_v47 = vpack.c.bf16 %v198_v44, %v197_v43  ;;  %v297_v57 = vld [vmem:[#allocation11] ss:$0 sm:$0xff] }
  0x67   :  { %410 = vmatpush3.bf16.msra.mxu0 %v409_v14  ;;  %v88_v48 = vmax.f32 %v87_v46, 0.0  ;;  %v199_v49 = vld [vmem:[#allocation9 + $0x70] sm:$0xff]  ;;  %v200_v50 = vld [vmem:[#allocation9 + $0x78] sm:$0xff] }
  0x68   :  { %411 = vmatprep.subr.bf16.mxu0 %v608_v0  ;;  %v448_v51 = vpack.c.bf16 %v200_v50, %v199_v49 }
  0x69   :  { %434 = vmatpush3.bf16.msra.mxu1 %v433_v24 }
  0x6a   :  { %435 = vmatprep.subr.bf16.mxu1 %v608_v0 }
  0x6b   :  { %413 = vmatpush3.bf16.msra.mxu0 %v412_v21 }
  0x6c   :  { %414 = vmatprep.subr.bf16.mxu0 %v608_v0 }
  0x6d   :  { %437 = vmatpush3.bf16.msra.mxu1 %v436_v30 }
  0x6e   :  { %438 = vmatprep.subr.bf16.mxu1 %v608_v0 }
  0x6f   :  { %416 = vmatpush3.bf16.msra.mxu0 %v415_v27 }
  0x70   :  { %417 = vmatprep.subr.bf16.mxu0 %v608_v0 }
  0x71   :  { %440 = vmatpush3.bf16.msra.mxu1 %v439_v36 }
  0x72   :  { %441 = vmatprep.subr.bf16.mxu1 %v608_v0 }
  0x73   :  { %419 = vmatpush3.bf16.msra.mxu0 %v418_v33 }
  0x74   :  { %420 = vmatprep.subr.bf16.mxu0 %v608_v0 }
  0x75   :  { %443 = vmatpush3.bf16.msra.mxu1 %v442_v42 }
  0x76   :  { %444 = vmatprep.subr.bf16.mxu1 %v608_v0 }
  0x77   :  { %422 = vmatpush3.bf16.msra.mxu0 %v421_v39 }
  0x78   :  { %423 = vmatprep.subr.bf16.mxu0 %v608_v0 }
  0x79   :  { %446 = vmatpush3.bf16.msra.mxu1 %v445_v47 }
  0x7a   :  { %447 = vmatprep.subr.bf16.mxu1 %v608_v0 }
  0x7b   :  { %425 = vmatpush3.bf16.msra.mxu0 %v424_v45 }
  0x7d   :  { %449 = vmatpush3.bf16.msra.mxu1 %v448_v51 }
  0x7e   :  { %365 = vmatmul.mubr.f32.vlgmr.msra.gmra.mrb[0].mxu0 %v88_v48 }
 0x151   :  { %v178_v53 = vpop.f32.mrb[0].mxu0 }
 0x152   :  { %v179_v54 = vadd.f32 %v296_v52, %v178_v53  ;;  %v366_v55 = vpop.f32.mrb[1].mxu0 }
 0x154   :  { %v182_v56 = vmax.f32 %v179_v54, 0.0 }
 0x156   :  { %400 = vmatmul.mubr.f32.vlgmr.msra.gmra.mrb[0].mxu1 %v182_v56 }
 0x229   :  { %v274_v58 = vpop.f32.mrb[0].mxu1 }
 0x22a   :  { %v275_v59 = vadd.f32 %v297_v57, %v274_v58  ;;  %v401_v60 = vpop.f32.mrb[1].mxu1 }
 0x22c   :  { %278 = vst [vmem:[#allocation12] sm:$0xff] %v275_v59 }
 0x22d   :  { %582 = shalt.err (!%p579_p2)
}
 0x22e   :  { %s583_s30 = scalar_lea.hbm %s735_s5, 128 }
 0x22f   :  { %p584_p3 = scmp.ne.s32.totalorder %s735_s5, %s583_s30  ;;  %p587_p4 = scmp.lt.u32.totalorder %s583_s30, %s735_s5 }
 0x231   :  { %p589_p5 = pnand %p587_p4, %p584_p3 }
 0x233   :  { %592 = shalt.err (!%p589_p5)
}
 0x234   :  { %288 = dma.vmem_to_hbm [thread:$0]  %s286_s27, 128, %s735_s5, [#allocation5]  }
 0x235   :  { %599 = dma.done.wait [#allocation5], 128  }
 0x236   :  { %600 = vsyncadd [#allocation5], 4294967168 }
 0x237   :  { %292 = vsyncpa [#allocation4], 1 }
 0x238   :  { %293 = vsyncpa [#allocation7], 1 }
 0x239   :  { %294 = vsyncpa [#allocation10], 1 }
 0x23a   :  { %295 = vsyncpa [#allocation5], 1 }

// kernel: tpu_custom_call.1
= control target key start
LH: loop header
LB: loop body
LE: loop exit
PB: predicated region body
PF: predicated region fallthrough
CT: control target
= control target key end

     0   :  { %10 = vsyncpa [#allocation4], 0  ;;  %s730_s0 = inlined_call_operand.hbm [shape: f32[8,128], index: 0, kind: input, shape index: {}]   ;;  %s731_s1 = inlined_call_operand.hbm [shape: f32[128,128], index: 1, kind: input, shape index: {}]   ;;  %s732_s2 = inlined_call_operand.hbm [shape: f32[1,128], index: 2, kind: input, shape index: {}]   ;;  %s733_s3 = inlined_call_operand.hbm [shape: f32[128,128], index: 3, kind: input, shape index: {}]   ;;  %s734_s4 = inlined_call_operand.hbm [shape: f32[1,128], index: 4, kind: input, shape index: {}]   ;;  %s735_s5 = inlined_call_operand.hbm [shape: f32[8,128], index: 5, kind: output, shape index: {}]  }
   0x1   :  { %11 = vsyncpa [#allocation7], 0 }
   0x2   :  { %12 = vsyncpa [#allocation10], 0 }
   0x3   :  { %13 = vsyncpa [#allocation5], 0  ;;  %s601_s18 = smov [#allocation6]   ;;  %s461_s22 = scalar_lea.hbm %s731_s1, 2048 }
   0x4   :  { %s29_s19 = sshll.u32 %s601_s18, 4  ;;  %p462_p0 = scmp.ne.s32.totalorder %s731_s1, %s461_s22  ;;  %s30_s19 = int_to_ptr.vmem [resolvable:$true] %s29_s19 }
   0x5   :  { %p465_p1 = scmp.lt.u32.totalorder %s461_s22, %s731_s1 }
   0x7   :  { %p467_p2 = pnand %p465_p1, %p462_p0 }
   0x9   :  { %470 = shalt.err (!%p467_p2)
}
   0xa   :  { %s471_s27 = scalar_lea.vmem %s30_s19, 2048  ;;  %p476_p4 = scmp.lt.s32.totalorder %s30_s19, %s30_s19 }
   0xb   :  { %p472_p3 = scmp.ne.s32.totalorder %s30_s19, %s471_s27  ;;  %p477_p5 = scmp.lt.s32.totalorder %s471_s27, %s471_s27 }
   0xd   :  { %p478_p6 = por %p477_p5, %p476_p4 }
   0xf   :  { %p479_p7 = pnand %p478_p6, %p472_p3 }
  0x11   :  { %482 = shalt.err (!%p479_p7)
}
  0x12   :  { %s602_s28 = smov 128   ;;  %s603_s29 = smov 8  }
  0x13   :  { %35 = dma.hbm_to_vmem [thread:$0]  %s731_s1, 2048, %s30_s19, [#allocation7], %s602_s28, %s602_s28, %s603_s29  }
  0x14   :  { %s604_s7 = smov [#allocation9]   ;;  %s605_s9 = smov [#allocation3]  }
  0x15   :  { %s51_s8 = sshll.u32 %s604_s7, 4  ;;  %s20_s10 = sshll.u32 %s605_s9, 4  ;;  %s52_s8 = int_to_ptr.vmem [resolvable:$true] %s51_s8  ;;  %s21_s10 = int_to_ptr.vmem [resolvable:$true] %s20_s10 }
  0x16   :  { %s483_s13 = scalar_lea.hbm %s733_s3, 2048 }
  0x17   :  { %p484_p8 = scmp.ne.s32.totalorder %s733_s3, %s483_s13  ;;  %p487_p9 = scmp.lt.u32.totalorder %s483_s13, %s733_s3 }
  0x19   :  { %p489_p10 = pnand %p487_p9, %p484_p8 }
  0x1b   :  { %492 = shalt.err (!%p489_p10)
}
  0x1c   :  { %s493_s1 = scalar_lea.vmem %s52_s8, 2048  ;;  %p498_p12 = scmp.lt.s32.totalorder %s52_s8, %s52_s8 }
  0x1d   :  { %p494_p11 = scmp.ne.s32.totalorder %s52_s8, %s493_s1  ;;  %p499_p13 = scmp.lt.s32.totalorder %s493_s1, %s493_s1 }
  0x1f   :  { %p500_p0 = por %p499_p13, %p498_p12 }
  0x21   :  { %p501_p1 = pnand %p500_p0, %p494_p11 }
  0x23   :  { %504 = shalt.err (!%p501_p1)
}
  0x24   :  { %57 = dma.hbm_to_vmem [thread:$0]  %s733_s3, 2048, %s52_s8, [#allocation10], %s602_s28, %s602_s28, %s603_s29  }
  0x25   :  { %s505_s22 = scalar_lea.hbm %s730_s0, 128 }
  0x26   :  { %p506_p2 = scmp.ne.s32.totalorder %s730_s0, %s505_s22  ;;  %p509_p3 = scmp.lt.u32.totalorder %s505_s22, %s730_s0 }
  0x28   :  { %p511_p4 = pnand %p509_p3, %p506_p2 }
  0x2a   :  { %514 = shalt.err (!%p511_p4)
}
  0x2b   :  { %s515_s27 = scalar_lea.vmem %s21_s10, 128  ;;  %p520_p6 = scmp.lt.s32.totalorder %s21_s10, %s21_s10 }
  0x2c   :  { %p516_p5 = scmp.ne.s32.totalorder %s21_s10, %s515_s27  ;;  %p521_p7 = scmp.lt.s32.totalorder %s515_s27, %s515_s27 }
  0x2e   :  { %p522_p8 = por %p521_p7, %p520_p6 }
  0x30   :  { %p523_p9 = pnand %p522_p8, %p516_p5 }
  0x32   :  { %526 = shalt.err (!%p523_p9)
}
  0x33   :  { %23 = dma.hbm_to_vmem [thread:$0]  %s730_s0, 128, %s21_s10, [#allocation4]  }
  0x34   :  { %s606_s29 = smov [#allocation8]   ;;  %s607_s6 = smov [#allocation11]  }
  0x35   :  { %s42_s30 = sshll.u32 %s606_s29, 4  ;;  %s64_s7 = sshll.u32 %s607_s6, 4  ;;  %s43_s30 = int_to_ptr.vmem [resolvable:$true] %s42_s30  ;;  %s65_s7 = int_to_ptr.vmem [resolvable:$true] %s64_s7 }
  0x36   :  { %s527_s11 = scalar_lea.hbm %s732_s2, 16 }
  0x37   :  { %p528_p10 = scmp.ne.s32.totalorder %s732_s2, %s527_s11  ;;  %p531_p11 = scmp.lt.u32.totalorder %s527_s11, %s732_s2 }
  0x39   :  { %p533_p12 = pnand %p531_p11, %p528_p10 }
  0x3b   :  { %536 = shalt.err (!%p533_p12)
}
  0x3c   :  { %s537_s0 = scalar_lea.vmem %s43_s30, 16  ;;  %s541_s10 = scalar_lea.vmem %s43_s30, 32 }
  0x3d   :  { %p538_p13 = scmp.ne.s32.totalorder %s43_s30, %s537_s0  ;;  %p542_p0 = scmp.lt.s32.totalorder %s43_s30, %s43_s30 }
  0x3e   :  { %p543_p1 = scmp.lt.s32.totalorder %s541_s10, %s537_s0 }
  0x40   :  { %p544_p2 = por %p543_p1, %p542_p0 }
  0x42   :  { %p545_p3 = pnand %p544_p2, %p538_p13 }
  0x44   :  { %548 = shalt.err (!%p545_p3)
}
  0x45   :  { %45 = dma.hbm_to_vmem [thread:$0]  %s732_s2, 16, %s43_s30, [#allocation7]  }
  0x46   :  { %s549_s19 = scalar_lea.hbm %s734_s4, 16 }
  0x47   :  { %p550_p4 = scmp.ne.s32.totalorder %s734_s4, %s549_s19  ;;  %p553_p5 = scmp.lt.u32.totalorder %s549_s19, %s734_s4 }
  0x49   :  { %p555_p6 = pnand %p553_p5, %p550_p4 }
  0x4b   :  { %558 = shalt.err (!%p555_p6)
}
  0x4c   :  { %s559_s24 = scalar_lea.vmem %s65_s7, 16  ;;  %s563_s25 = scalar_lea.vmem %s65_s7, 32 }
  0x4d   :  { %p560_p7 = scmp.ne.s32.totalorder %s65_s7, %s559_s24  ;;  %p564_p8 = scmp.lt.s32.totalorder %s65_s7, %s65_s7 }
  0x4e   :  { %p565_p9 = scmp.lt.s32.totalorder %s563_s25, %s559_s24 }
  0x50   :  { %p566_p10 = por %p565_p9, %p564_p8 }
  0x52   :  { %p567_p11 = pnand %p566_p10, %p560_p7 }
  0x54   :  { %570 = shalt.err (!%p567_p11)
}
  0x55   :  { %67 = dma.hbm_to_vmem [thread:$0]  %s734_s4, 16, %s65_s7, [#allocation10]  }
  0x56   :  { %593 = dma.done.wait [#allocation4], 128  }
  0x57   :  { %594 = vsyncadd [#allocation4], 4294967168 }
  0x58   :  { %595 = dma.done.wait [#allocation7], 2064  }
  0x59   :  { %596 = vsyncadd [#allocation7], 4294965232 }
  0x5a   :  { %597 = dma.done.wait [#allocation10], 2064  }
  0x5b   :  { %598 = vsyncadd [#allocation10], 4294965232  ;;  %v608_v0 = vmov 0.0|0.0   ;;  %vm609_vm0 = vmmov 0   ;;  %v610_v1 = vmov 0.0   ;;  %v89_v2 = vld [vmem:[#allocation6] sm:$0xff] }
  0x5c   :  { %402 = vmatprep.subr.bf16.mxu0 %v608_v0  ;;  %364 = vmatprep.mubr.msk.f32.mxu0 %vm609_vm0, %v610_v1  ;;  %v90_v3 = vld [vmem:[#allocation6 + $0x8] sm:$0xff]  ;;  %v91_v4 = vld [vmem:[#allocation6 + $0x10] sm:$0xff]  ;;  %v92_v6 = vld [vmem:[#allocation6 + $0x18] sm:$0xff]  ;;  %s611_s4 = smov [#allocation12]  }
  0x5d   :  { %426 = vmatprep.subr.bf16.mxu1 %v608_v0  ;;  %399 = vmatprep.mubr.msk.f32.mxu1 %vm609_vm0, %v610_v1  ;;  %v403_v5 = vpack.c.bf16 %v90_v3, %v89_v2  ;;  %v406_v7 = vpack.c.bf16 %v92_v6, %v91_v4  ;;  %v93_v8 = vld [vmem:[#allocation6 + $0x20] sm:$0xff]  ;;  %v94_v9 = vld [vmem:[#allocation6 + $0x28] sm:$0xff]  ;;  %v187_v12 = vld [vmem:[#allocation9 + $0x10] sm:$0xff]  ;;  %s285_s27 = sshll.u32 %s611_s4, 4  ;;  %s286_s27 = int_to_ptr.vmem [resolvable:$true] %s285_s27 }
  0x5e   :  { %v185_v10 = vld [vmem:[#allocation9] sm:$0xff]  ;;  %v186_v11 = vld [vmem:[#allocation9 + $0x8] sm:$0xff]  ;;  %v188_v13 = vld [vmem:[#allocation9 + $0x18] sm:$0xff]  ;;  %v409_v14 = vpack.c.bf16 %v94_v9, %v93_v8  ;;  %s571_s3 = scalar_lea.vmem %s286_s27, 128  ;;  %p576_p13 = scmp.lt.s32.totalorder %s286_s27, %s286_s27 }
  0x5f   :  { %404 = vmatpush3.bf16.msra.mxu0 %v403_v5  ;;  %v427_v15 = vpack.c.bf16 %v186_v11, %v185_v10  ;;  %v95_v16 = vld [vmem:[#allocation6 + $0x30] sm:$0xff]  ;;  %v96_v17 = vld [vmem:[#allocation6 + $0x38] sm:$0xff]  ;;  %v430_v18 = vpack.c.bf16 %v188_v13, %v187_v12  ;;  %v189_v19 = vld [vmem:[#allocation9 + $0x20] sm:$0xff]  ;;  %p572_p12 = scmp.ne.s32.totalorder %s286_s27, %s571_s3  ;;  %p577_p0 = scmp.lt.s32.totalorder %s571_s3, %s571_s3 }
  0x60   :  { %405 = vmatprep.subr.bf16.mxu0 %v608_v0  ;;  %v190_v20 = vld [vmem:[#allocation9 + $0x28] sm:$0xff]  ;;  %v412_v21 = vpack.c.bf16 %v96_v17, %v95_v16  ;;  %v97_v22 = vld [vmem:[#allocation6 + $0x40] sm:$0xff]  ;;  %v191_v25 = vld [vmem:[#allocation9 + $0x30] sm:$0xff] }
  0x61   :  { %428 = vmatpush3.bf16.msra.mxu1 %v427_v15  ;;  %v98_v23 = vld [vmem:[#allocation6 + $0x48] sm:$0xff]  ;;  %v433_v24 = vpack.c.bf16 %v190_v20, %v189_v19  ;;  %v192_v26 = vld [vmem:[#allocation9 + $0x38] sm:$0xff]  ;;  %v99_v28 = vld [vmem:[#allocation6 + $0x50] sm:$0xff]  ;;  %p578_p1 = por %p577_p0, %p576_p13 }
  0x62   :  { %429 = vmatprep.subr.bf16.mxu1 %v608_v0  ;;  %v415_v27 = vpack.c.bf16 %v98_v23, %v97_v22  ;;  %v100_v29 = vld [vmem:[#allocation6 + $0x58] sm:$0xff]  ;;  %v436_v30 = vpack.c.bf16 %v192_v26, %v191_v25  ;;  %v193_v31 = vld [vmem:[#allocation9 + $0x40] sm:$0xff]  ;;  %v194_v32 = vld [vmem:[#allocation9 + $0x48] sm:$0xff] }
  0x63   :  { %407 = vmatpush3.bf16.msra.mxu0 %v406_v7  ;;  %v418_v33 = vpack.c.bf16 %v100_v29, %v99_v28  ;;  %v101_v34 = vld [vmem:[#allocation6 + $0x60] sm:$0xff]  ;;  %v102_v35 = vld [vmem:[#allocation6 + $0x68] sm:$0xff]  ;;  %v439_v36 = vpack.c.bf16 %v194_v32, %v193_v31  ;;  %v195_v37 = vld [vmem:[#allocation9 + $0x50] sm:$0xff]  ;;  %p579_p2 = pnand %p578_p1, %p572_p12 }
  0x64   :  { %408 = vmatprep.subr.bf16.mxu0 %v608_v0  ;;  %v196_v38 = vld [vmem:[#allocation9 + $0x58] sm:$0xff]  ;;  %v421_v39 = vpack.c.bf16 %v102_v35, %v101_v34  ;;  %v103_v40 = vld [vmem:[#allocation6 + $0x70] sm:$0xff]  ;;  %v197_v43 = vld [vmem:[#allocation9 + $0x60] sm:$0xff] }
  0x65   :  { %431 = vmatpush3.bf16.msra.mxu1 %v430_v18  ;;  %v104_v41 = vld [vmem:[#allocation6 + $0x78] sm:$0xff]  ;;  %v442_v42 = vpack.c.bf16 %v196_v38, %v195_v37  ;;  %v198_v44 = vld [vmem:[#allocation9 + $0x68] sm:$0xff]  ;;  %v296_v52 = vld [vmem:[#allocation8] ss:$0 sm:$0xff] }
  0x66   :  { %432 = vmatprep.subr.bf16.mxu1 %v608_v0  ;;  %v424_v45 = vpack.c.bf16 %v104_v41, %v103_v40  ;;  %v87_v46 = vld [vmem:[#allocation3] sm:$0xff]  ;;  %v445_v47 = vpack.c.bf16 %v198_v44, %v197_v43  ;;  %v297_v57 = vld [vmem:[#allocation11] ss:$0 sm:$0xff] }
  0x67   :  { %410 = vmatpush3.bf16.msra.mxu0 %v409_v14  ;;  %v88_v48 = vmax.f32 %v87_v46, 0.0  ;;  %v199_v49 = vld [vmem:[#allocation9 + $0x70] sm:$0xff]  ;;  %v200_v50 = vld [vmem:[#allocation9 + $0x78] sm:$0xff] }
  0x68   :  { %411 = vmatprep.subr.bf16.mxu0 %v608_v0  ;;  %v448_v51 = vpack.c.bf16 %v200_v50, %v199_v49 }
  0x69   :  { %434 = vmatpush3.bf16.msra.mxu1 %v433_v24 }
  0x6a   :  { %435 = vmatprep.subr.bf16.mxu1 %v608_v0 }
  0x6b   :  { %413 = vmatpush3.bf16.msra.mxu0 %v412_v21 }
  0x6c   :  { %414 = vmatprep.subr.bf16.mxu0 %v608_v0 }
  0x6d   :  { %437 = vmatpush3.bf16.msra.mxu1 %v436_v30 }
  0x6e   :  { %438 = vmatprep.subr.bf16.mxu1 %v608_v0 }
  0x6f   :  { %416 = vmatpush3.bf16.msra.mxu0 %v415_v27 }
  0x70   :  { %417 = vmatprep.subr.bf16.mxu0 %v608_v0 }
  0x71   :  { %440 = vmatpush3.bf16.msra.mxu1 %v439_v36 }
  0x72   :  { %441 = vmatprep.subr.bf16.mxu1 %v608_v0 }
  0x73   :  { %419 = vmatpush3.bf16.msra.mxu0 %v418_v33 }
  0x74   :  { %420 = vmatprep.subr.bf16.mxu0 %v608_v0 }
  0x75   :  { %443 = vmatpush3.bf16.msra.mxu1 %v442_v42 }
  0x76   :  { %444 = vmatprep.subr.bf16.mxu1 %v608_v0 }
  0x77   :  { %422 = vmatpush3.bf16.msra.mxu0 %v421_v39 }
  0x78   :  { %423 = vmatprep.subr.bf16.mxu0 %v608_v0 }
  0x79   :  { %446 = vmatpush3.bf16.msra.mxu1 %v445_v47 }
  0x7a   :  { %447 = vmatprep.subr.bf16.mxu1 %v608_v0 }
  0x7b   :  { %425 = vmatpush3.bf16.msra.mxu0 %v424_v45 }
  0x7d   :  { %449 = vmatpush3.bf16.msra.mxu1 %v448_v51 }
  0x7e   :  { %365 = vmatmul.mubr.f32.vlgmr.msra.gmra.mrb[0].mxu0 %v88_v48 }
 0x151   :  { %v178_v53 = vpop.f32.mrb[0].mxu0 }
 0x152   :  { %v179_v54 = vadd.f32 %v296_v52, %v178_v53  ;;  %v366_v55 = vpop.f32.mrb[1].mxu0 }
 0x154   :  { %v182_v56 = vmax.f32 %v179_v54, 0.0 }
 0x156   :  { %400 = vmatmul.mubr.f32.vlgmr.msra.gmra.mrb[0].mxu1 %v182_v56 }
 0x229   :  { %v274_v58 = vpop.f32.mrb[0].mxu1 }
 0x22a   :  { %v275_v59 = vadd.f32 %v297_v57, %v274_v58  ;;  %v401_v60 = vpop.f32.mrb[1].mxu1 }
 0x22c   :  { %278 = vst [vmem:[#allocation12] sm:$0xff] %v275_v59 }
 0x22d   :  { %582 = shalt.err (!%p579_p2)
}
 0x22e   :  { %s583_s30 = scalar_lea.hbm %s735_s5, 128 }
 0x22f   :  { %p584_p3 = scmp.ne.s32.totalorder %s735_s5, %s583_s30  ;;  %p587_p4 = scmp.lt.u32.totalorder %s583_s30, %s735_s5 }
 0x231   :  { %p589_p5 = pnand %p587_p4, %p584_p3 }
 0x233   :  { %592 = shalt.err (!%p589_p5)
}
 0x234   :  { %288 = dma.vmem_to_hbm [thread:$0]  %s286_s27, 128, %s735_s5, [#allocation5]  }
 0x235   :  { %599 = dma.done.wait [#allocation5], 128  }
 0x236   :  { %600 = vsyncadd [#allocation5], 4294967168 }
 0x237   :  { %292 = vsyncpa [#allocation4], 1 }
 0x238   :  { %293 = vsyncpa [#allocation7], 1 }
 0x239   :  { %294 = vsyncpa [#allocation10], 1 }
 0x23a   :  { %295 = vsyncpa [#allocation5], 1 }

</bundles_post_ra>
